<compile_context>
chip_gen: v6e
topology: v6e:2x2x1
jax: 0.10.0
libtpu: 0.0.40
codegen_flags: <defaults>
</compile_context>

<pallas_src>
import jax
import jax.numpy as jnp
import numpy as np
from jax import lax
from jax.experimental import pallas as pl
from jax.experimental.pallas import tpu as pltpu


def _gru_kernel(gx_ref, lens_ref, h0_ref, whh_ref, bhh_ref, out_ref, hN_ref):
    """One grid step == Tb timesteps of the GRU recurrence for one batch block.

    gx_ref:   (Tb, Bb, 3H) f32  precomputed x_t @ W_ih^T + b_ih, gate order [r|z|n]
    lens_ref: (Bb, 1)      i32  sequence lengths
    h0_ref:   (Bb, H)      f32  initial hidden state
    whh_ref:  (H, 3H)      bf16 W_hh^T
    bhh_ref:  (1, 3H)      f32  b_hh
    out_ref:  (Tb, Bb, H)  f32  per-timestep output (zeros past each length)
    hN_ref:   (Bb, H)      f32  hidden state; resident across the time grid axis,
                                doubles as the carry (no extra scratch).
    """
    tb = pl.program_id(1)
    Tb = gx_ref.shape[0]
    H = hN_ref.shape[1]

    @pl.when(tb == 0)
    def _():
        hN_ref[...] = h0_ref[...]

    lens = lens_ref[...]                       # (Bb, 1) int32
    bhh = bhh_ref[...]                         # (1, 3H) f32
    whh = whh_ref[...]                         # (H, 3H) bf16
    t0 = tb * Tb

    def step(i, h_prev):
        gx = gx_ref[i]                         # (Bb, 3H) f32, b_ih already folded in
        gh = jnp.dot(h_prev.astype(whh.dtype), whh,
                     preferred_element_type=jnp.float32) + bhh
        r = jax.nn.sigmoid(gx[:, 0 * H:1 * H] + gh[:, 0 * H:1 * H])
        z = jax.nn.sigmoid(gx[:, 1 * H:2 * H] + gh[:, 1 * H:2 * H])
        n = jnp.tanh(gx[:, 2 * H:3 * H] + r * gh[:, 2 * H:3 * H])
        h_new = (1.0 - z) * n + z * h_prev     # (Bb, H)

        # Packed-sequence semantics: advance only while t < len[b]; padding
        # emits zeros in `output` and freezes the hidden state.
        mask = lens > (t0 + i)                 # (Bb, 1) bool
        h_next = jnp.where(mask, h_new, h_prev)
        out_ref[i] = jnp.where(mask, h_next, 0.0).astype(out_ref.dtype)
        return h_next

    hN_ref[...] = lax.fori_loop(0, Tb, step, hN_ref[...], unroll=True)


def gru_packed_pallas(x_emb, lens, h0, w_ih, w_hh, b_ih, b_hh, *,
                      t_out=None, time_block=8, batch_block=None,
                      weights_dtype=jnp.bfloat16):
    """Masked (packed-sequence) GRU over time with a Pallas kernel.

    x_emb: [T, B, E] float32
    lens:  [B]       int32
    h0:    [B, H]    float32
    w_ih:  [3H, E], w_hh: [3H, H], b_ih/b_hh: [3H]  (PyTorch parameter layout)
    t_out: static int, number of output timesteps (= max(lens)); defaults to T.
    Returns (output [t_out, B, H] f32, hidden [B, H] f32).
    """
    T, B, E = x_emb.shape
    H = h0.shape[-1]
    f32 = jnp.float32

    t_out = T if t_out is None else int(t_out)
    t_out = max(1, t_out)

    # Time blocking: Tb timesteps per grid step.
    Tb = max(1, min(int(time_block), t_out))
    n_tb = -(-t_out // Tb)
    Tpad = n_tb * Tb

    # Pad batch to a sublane multiple (8 for the f32 hidden carry).
    Bp = -(-B // 8) * 8
    if batch_block is None:
        Bb = Bp                                # single block (default: 1 TensorCore)
    else:
        Bb = min(Bp, max(8, (-(-int(batch_block) // 8)) * 8))
        if Bp % Bb != 0:
            Bb = Bp
    n_bb = Bp // Bb

    # --- Hoisted input projection: one large MXU-friendly matmul (plain-JAX glue).
    x_use = x_emb[:min(T, t_out)].astype(f32)                     # (Tu, B, E)
    gx = (jnp.dot(x_use.reshape(-1, E), jnp.asarray(w_ih, f32).T,
                  preferred_element_type=f32)
          + jnp.asarray(b_ih, f32))                               # b_ih folded in
    gx = gx.reshape(x_use.shape[0], B, 3 * H)

    # Pad time to a multiple of Tb and batch to Bp. Padded rows have lens=0 so
    # they never update the hidden state and emit zeros.
    gx = jnp.pad(gx, ((0, Tpad - gx.shape[0]), (0, Bp - B), (0, 0)))
    lens_p = jnp.pad(jnp.asarray(lens, jnp.int32), (0, Bp - B)).reshape(Bp, 1)
    h0_p = jnp.pad(h0.astype(f32), ((0, Bp - B), (0, 0)))

    # Recurrent weights: bf16 inputs to the MXU, f32 accumulation in-kernel.
    whh_t = jnp.asarray(w_hh, f32).T.astype(weights_dtype)        # (H, 3H)
    bhh = jnp.asarray(b_hh, f32).reshape(1, 3 * H)

    # Explicit VMEM budget sized to the resident / double-buffered blocks.
    w_bytes = jnp.dtype(weights_dtype).itemsize
    est = (2 * Tb * Bb * 3 * H * 4          # gx blocks (double-buffered)
           + 2 * Tb * Bb * H * 4            # out blocks
           + 2 * H * 3 * H * w_bytes        # W_hh^T
           + 2 * Bb * H * 4                 # h0
           + Bb * H * 4                     # resident hN carry
           + 2 * Bb * 128 * 4               # lens (lane-padded)
           + 2 * 8 * 3 * H * 4)             # b_hh (sublane-padded)
    vmem_limit = int(min(max(est * 3 // 2 + (2 << 20), 4 << 20), 64 << 20))

    grid_spec = pltpu.PrefetchScalarGridSpec(
        num_scalar_prefetch=0,
        grid=(n_bb, n_tb),                  # time (sequential carry) axis last
        in_specs=[
            pl.BlockSpec((Tb, Bb, 3 * H), lambda bb, tb: (tb, bb, 0)),   # gx
            pl.BlockSpec((Bb, 1),         lambda bb, tb: (bb, 0)),       # lens
            pl.BlockSpec((Bb, H),         lambda bb, tb: (bb, 0)),       # h0
            pl.BlockSpec((H, 3 * H),      lambda bb, tb: (0, 0)),        # W_hh^T
            pl.BlockSpec((1, 3 * H),      lambda bb, tb: (0, 0)),        # b_hh
        ],
        out_specs=[
            pl.BlockSpec((Tb, Bb, H), lambda bb, tb: (tb, bb, 0)),       # output
            pl.BlockSpec((Bb, H),     lambda bb, tb: (bb, 0)),           # hidden (resident)
        ],
    )

    out, h_n = pl.pallas_call(
        _gru_kernel,
        out_shape=(
            jax.ShapeDtypeStruct((Tpad, Bp, H), f32),
            jax.ShapeDtypeStruct((Bp, H), f32),
        ),
        grid_spec=grid_spec,
        compiler_params=pltpu.CompilerParams(
            dimension_semantics=("parallel", "arbitrary"),
            vmem_limit_bytes=vmem_limit),
    )(gx, lens_p, h0_p, whh_t, bhh)

    return out[:t_out, :B], h_n[:B]


class EncoderPallas:
    """JAX/Pallas mirror of the PyTorch Encoder (embedding + single-layer GRU)."""

    def __init__(self, config, vocab_size, key):
        self.enc_units = config.get('encoder_hidden', 1024)
        self.vocab_size = vocab_size
        self.embedding_dim = config.get('embedding_dim', 256)
        self.time_block = config.get('time_block', 8)
        E, H, V = self.embedding_dim, self.enc_units, self.vocab_size
        k = jax.random.split(key, 5)
        # Deterministic synthetic parameters (PyTorch shapes/layout).
        self.embedding = jax.random.normal(k[0], (V, E), jnp.float32) * 0.1
        bound = 1.0 / np.sqrt(H)
        self.w_ih = jax.random.uniform(k[1], (3 * H, E), jnp.float32, -bound, bound)
        self.w_hh = jax.random.uniform(k[2], (3 * H, H), jnp.float32, -bound, bound)
        self.b_ih = jax.random.uniform(k[3], (3 * H,), jnp.float32, -bound, bound)
        self.b_hh = jax.random.uniform(k[4], (3 * H,), jnp.float32, -bound, bound)

    def initialize_hidden_state(self, batch_size):
        return jnp.zeros((1, batch_size, self.enc_units), jnp.float32)

    def forward(self, x, init_state, lens, max_len):
        # x: [T, B] int32; init_state: [1, B, H]; lens: [B] int32 (sorted desc).
        # max_len must be a static Python int (== max(lens), the padded length
        # pad_packed_sequence would return); the time grid is trimmed to it.
        x_emb = jnp.take(self.embedding, x, axis=0)          # [T, B, E] (glue)
        out, h_n = gru_packed_pallas(
            x_emb, lens, init_state[0],
            self.w_ih, self.w_hh, self.b_ih, self.b_hh,
            t_out=int(max_len), time_block=self.time_block)
        return out, h_n[None, :, :]


def _gru_packed_ref(x_emb, lens, h0, w_ih, w_hh, b_ih, b_hh):
    """Pure-JAX f32 reference of the packed GRU (for correctness check)."""
    H = h0.shape[-1]
    lens = lens.reshape(-1, 1)

    def step(h, inp):
        x_t, t = inp
        gx = x_t @ w_ih.T + b_ih
        gh = h @ w_hh.T + b_hh
        r = jax.nn.sigmoid(gx[:, :H] + gh[:, :H])
        z = jax.nn.sigmoid(gx[:, H:2 * H] + gh[:, H:2 * H])
        n = jnp.tanh(gx[:, 2 * H:] + r * gh[:, 2 * H:])
        h_new = (1.0 - z) * n + z * h
        mask = lens > t
        h_next = jnp.where(mask, h_new, h)
        y = jnp.where(mask, h_new, 0.0)
        return h_next, y

    T = x_emb.shape[0]
    h_fin, ys = lax.scan(step, h0, (x_emb, jnp.arange(T, dtype=jnp.int32)))
    return ys, h_fin


if __name__ == "__main__":
    key = jax.random.PRNGKey(0)
    k_param, k_tok = jax.random.split(key)

    # Small shapes; time_block=4 so the 8-step sequence exercises the
    # resident-hidden carry across multiple time grid blocks.
    config = {"encoder_hidden": 32, "embedding_dim": 32, "time_block": 4}
    vocab_size = 50
    T, B = 8, 4
    enc = EncoderPallas(config, vocab_size, k_param)

    # Tokens [T, B], lengths sorted descending (pack_padded_sequence contract).
    tokens = jax.random.randint(k_tok, (T, B), 0, vocab_size, dtype=jnp.int32)
    lens = jnp.array([8, 6, 5, 3], dtype=jnp.int32)
    max_len = 8
    init_state = enc.initialize_hidden_state(B)

    output, hidden = enc.forward(tokens, init_state, lens, max_len)
    output = jax.block_until_ready(output)
    hidden = jax.block_until_ready(hidden)

    # Sanity-check against a pure-JAX f32 reference. Tolerance relaxed because
    # the recurrent matmul uses bf16 MXU inputs (f32 accumulation / gate math).
    x_emb = jnp.take(enc.embedding, tokens, axis=0)
    out_ref, h_ref = _gru_packed_ref(
        x_emb, lens, init_state[0], enc.w_ih, enc.w_hh, enc.b_ih, enc.b_hh)
    assert output.shape == (max_len, B, config["encoder_hidden"])
    assert hidden.shape == (1, B, config["encoder_hidden"])
    np.testing.assert_allclose(np.asarray(output), np.asarray(out_ref),
                               rtol=2e-2, atol=2e-2)
    np.testing.assert_allclose(np.asarray(hidden[0]), np.asarray(h_ref),
                               rtol=2e-2, atol=2e-2)

    print("KERNEL_OK")
</pallas_src>

<mosaic_0001>
module attributes {stable_mosaic.version = 11 : i64} {
  func.func @_gru_kernel(%arg0: i32, %arg1: i32, %arg2: memref<4x8x96xf32, #tpu.memory_space<vmem>>, %arg3: memref<8x1xi32, #tpu.memory_space<vmem>>, %arg4: memref<8x32xf32, #tpu.memory_space<vmem>>, %arg5: memref<32x96xbf16, #tpu.memory_space<vmem>>, %arg6: memref<1x96xf32, #tpu.memory_space<vmem>>, %arg7: memref<4x8x32xf32, #tpu.memory_space<vmem>>, %arg8: memref<8x32xf32, #tpu.memory_space<vmem>>) attributes {dimension_semantics = [#tpu.dimension_semantics<parallel>, #tpu.dimension_semantics<arbitrary>], iteration_bounds = array<i64: 1, 2>, scalar_prefetch = 0 : i64, scratch_operands = 0 : i64, tpu.core_type = #tpu.core_type<tc>, window_params = [{transform_indices = @transform_0, window_bounds = array<i64: 4, 8, 96>}, {transform_indices = @transform_1, window_bounds = array<i64: 8, 1>}, {transform_indices = @transform_2, window_bounds = array<i64: 8, 32>}, {pipeline_mode = #tpu.pipeline_mode<synchronous>, transform_indices = @transform_3, window_bounds = array<i64: 32, 96>}, {pipeline_mode = #tpu.pipeline_mode<synchronous>, transform_indices = @transform_4, window_bounds = array<i64: 1, 96>}, {transform_indices = @transform_5, window_bounds = array<i64: 4, 8, 32>}, {transform_indices = @transform_6, window_bounds = array<i64: 8, 32>}]} {
    %c0_i32 = arith.constant 0 : i32
    %0 = arith.cmpi eq, %arg1, %c0_i32 : i32
    %1 = arith.extui %0 : i1 to i32
    %c0_i32_0 = arith.constant 0 : i32
    %2 = arith.cmpi ne, %1, %c0_i32_0 : i32
    scf.if %2 {
      %c0_47 = arith.constant 0 : index
      %c0_48 = arith.constant 0 : index
      %197 = vector.load %arg4[%c0_47, %c0_48] : memref<8x32xf32, #tpu.memory_space<vmem>>, vector<8x32xf32>
      %c0_49 = arith.constant 0 : index
      %c0_50 = arith.constant 0 : index
      %198 = vector.load %arg8[%c0_49, %c0_50] : memref<8x32xf32, #tpu.memory_space<vmem>>, vector<8x32xf32>
      tpu.vector_store %arg8[%c0_49, %c0_50], %197 {strides = array<i32>} : memref<8x32xf32, #tpu.memory_space<vmem>>, vector<8x32xf32>,
    } else {
    }
    %c0 = arith.constant 0 : index
    %c0_1 = arith.constant 0 : index
    %3 = vector.load %arg3[%c0, %c0_1] : memref<8x1xi32, #tpu.memory_space<vmem>>, vector<8x1xi32>
    %c0_2 = arith.constant 0 : index
    %c0_3 = arith.constant 0 : index
    %4 = vector.load %arg6[%c0_2, %c0_3] : memref<1x96xf32, #tpu.memory_space<vmem>>, vector<1x96xf32>
    %c0_4 = arith.constant 0 : index
    %c0_5 = arith.constant 0 : index
    %5 = vector.load %arg5[%c0_4, %c0_5] : memref<32x96xbf16, #tpu.memory_space<vmem>>, vector<32x96xbf16>
    %c4_i32 = arith.constant 4 : i32
    %6 = arith.muli %arg1, %c4_i32 : i32
    %c0_6 = arith.constant 0 : index
    %c0_7 = arith.constant 0 : index
    %7 = vector.load %arg8[%c0_6, %c0_7] : memref<8x32xf32, #tpu.memory_space<vmem>>, vector<8x32xf32>
    %c0_i32_8 = arith.constant 0 : i32
    %8 = arith.index_cast %c0_i32_8 : i32 to index
    %c0_9 = arith.constant 0 : index
    %c0_10 = arith.constant 0 : index
    %9 = vector.load %arg2[%8, %c0_9, %c0_10] : memref<4x8x96xf32, #tpu.memory_space<vmem>>, vector<1x8x96xf32>
    %10 = vector.shape_cast %9 : vector<1x8x96xf32> to vector<8x96xf32>
    %11 = arith.truncf %7 : vector<8x32xf32> to vector<8x32xbf16>
    %cst = arith.constant dense<0.000000e+00> : vector<8x96xf32>
    %12 = tpu.matmul %11, %5, %cst {dimension_numbers = #tpu.dot_dimension_numbers<[1], [0], [0], [1], [0, 0, 1, 1], [], []>} : vector<8x32xbf16>, vector<32x96xbf16>, vector<8x96xf32> -> vector<8x96xf32>
    %13 = vector.broadcast %4 : vector<1x96xf32> to vector<8x96xf32>
    %14 = arith.addf %12, %13 : vector<8x96xf32>
    %15 = vector.extract_strided_slice %10 {offsets = [0, 0], sizes = [8, 32], strides = [1, 1]} : vector<8x96xf32> to vector<8x32xf32>
    %16 = vector.extract_strided_slice %14 {offsets = [0, 0], sizes = [8, 32], strides = [1, 1]} : vector<8x96xf32> to vector<8x32xf32>
    %17 = arith.addf %15, %16 : vector<8x32xf32>
    %18 = arith.negf %17 : vector<8x32xf32>
    %19 = math.exp %18 : vector<8x32xf32>
    %cst_11 = arith.constant 1.000000e+00 : f32
    %20 = vector.broadcast %cst_11 : f32 to vector<8x32xf32>
    %21 = arith.addf %20, %19 : vector<8x32xf32>
    %22 = arith.divf %20, %21 : vector<8x32xf32>
    %23 = vector.extract_strided_slice %10 {offsets = [0, 32], sizes = [8, 32], strides = [1, 1]} : vector<8x96xf32> to vector<8x32xf32>
    %24 = vector.extract_strided_slice %14 {offsets = [0, 32], sizes = [8, 32], strides = [1, 1]} : vector<8x96xf32> to vector<8x32xf32>
    %25 = arith.addf %23, %24 : vector<8x32xf32>
    %26 = arith.negf %25 : vector<8x32xf32>
    %27 = math.exp %26 : vector<8x32xf32>
    %cst_12 = arith.constant 1.000000e+00 : f32
    %28 = vector.broadcast %cst_12 : f32 to vector<8x32xf32>
    %29 = arith.addf %28, %27 : vector<8x32xf32>
    %30 = arith.divf %28, %29 : vector<8x32xf32>
    %31 = vector.extract_strided_slice %10 {offsets = [0, 64], sizes = [8, 32], strides = [1, 1]} : vector<8x96xf32> to vector<8x32xf32>
    %32 = vector.extract_strided_slice %14 {offsets = [0, 64], sizes = [8, 32], strides = [1, 1]} : vector<8x96xf32> to vector<8x32xf32>
    %33 = arith.mulf %22, %32 : vector<8x32xf32>
    %34 = arith.addf %31, %33 : vector<8x32xf32>
    %35 = math.tanh %34 : vector<8x32xf32>
    %cst_13 = arith.constant 1.000000e+00 : f32
    %36 = vector.broadcast %cst_13 : f32 to vector<8x32xf32>
    %37 = arith.subf %36, %30 : vector<8x32xf32>
    %38 = arith.mulf %37, %35 : vector<8x32xf32>
    %39 = arith.mulf %30, %7 : vector<8x32xf32>
    %40 = arith.addf %38, %39 : vector<8x32xf32>
    %41 = arith.addi %6, %c0_i32_8 : i32
    %42 = vector.broadcast %41 : i32 to vector<8x1xi32>
    %43 = arith.cmpi sgt, %3, %42 : vector<8x1xi32>
    %44 = vector.shape_cast %43 : vector<8x1xi1> to vector<8x1xi1>
    %45 = vector.broadcast %44 : vector<8x1xi1> to vector<8x32xi1>
    %46 = arith.select %45, %40, %7 : vector<8x32xi1>, vector<8x32xf32>
    %cst_14 = arith.constant 0.000000e+00 : f32
    %47 = vector.shape_cast %43 : vector<8x1xi1> to vector<8x1xi1>
    %48 = vector.broadcast %47 : vector<8x1xi1> to vector<8x32xi1>
    %49 = vector.broadcast %cst_14 : f32 to vector<8x32xf32>
    %50 = arith.select %48, %46, %49 : vector<8x32xi1>, vector<8x32xf32>
    %51 = arith.index_cast %c0_i32_8 : i32 to index
    %c0_15 = arith.constant 0 : index
    %c0_16 = arith.constant 0 : index
    %52 = vector.load %arg7[%51, %c0_15, %c0_16] : memref<4x8x32xf32, #tpu.memory_space<vmem>>, vector<1x8x32xf32>
    %53 = vector.shape_cast %52 : vector<1x8x32xf32> to vector<8x32xf32>
    %54 = vector.shape_cast %50 : vector<8x32xf32> to vector<1x8x32xf32>
    tpu.vector_store %arg7[%51, %c0_15, %c0_16], %54 {strides = array<i32>} : memref<4x8x32xf32, #tpu.memory_space<vmem>>, vector<1x8x32xf32>,
    %c1_i32 = arith.constant 1 : i32
    %55 = arith.index_cast %c1_i32 : i32 to index
    %c0_17 = arith.constant 0 : index
    %c0_18 = arith.constant 0 : index
    %56 = vector.load %arg2[%55, %c0_17, %c0_18] : memref<4x8x96xf32, #tpu.memory_space<vmem>>, vector<1x8x96xf32>
    %57 = vector.shape_cast %56 : vector<1x8x96xf32> to vector<8x96xf32>
    %58 = arith.truncf %46 : vector<8x32xf32> to vector<8x32xbf16>
    %cst_19 = arith.constant dense<0.000000e+00> : vector<8x96xf32>
    %59 = tpu.matmul %58, %5, %cst_19 {dimension_numbers = #tpu.dot_dimension_numbers<[1], [0], [0], [1], [0, 0, 1, 1], [], []>} : vector<8x32xbf16>, vector<32x96xbf16>, vector<8x96xf32> -> vector<8x96xf32>
    %60 = vector.broadcast %4 : vector<1x96xf32> to vector<8x96xf32>
    %61 = arith.addf %59, %60 : vector<8x96xf32>
    %62 = vector.extract_strided_slice %57 {offsets = [0, 0], sizes = [8, 32], strides = [1, 1]} : vector<8x96xf32> to vector<8x32xf32>
    %63 = vector.extract_strided_slice %61 {offsets = [0, 0], sizes = [8, 32], strides = [1, 1]} : vector<8x96xf32> to vector<8x32xf32>
    %64 = arith.addf %62, %63 : vector<8x32xf32>
    %65 = arith.negf %64 : vector<8x32xf32>
    %66 = math.exp %65 : vector<8x32xf32>
    %cst_20 = arith.constant 1.000000e+00 : f32
    %67 = vector.broadcast %cst_20 : f32 to vector<8x32xf32>
    %68 = arith.addf %67, %66 : vector<8x32xf32>
    %69 = arith.divf %67, %68 : vector<8x32xf32>
    %70 = vector.extract_strided_slice %57 {offsets = [0, 32], sizes = [8, 32], strides = [1, 1]} : vector<8x96xf32> to vector<8x32xf32>
    %71 = vector.extract_strided_slice %61 {offsets = [0, 32], sizes = [8, 32], strides = [1, 1]} : vector<8x96xf32> to vector<8x32xf32>
    %72 = arith.addf %70, %71 : vector<8x32xf32>
    %73 = arith.negf %72 : vector<8x32xf32>
    %74 = math.exp %73 : vector<8x32xf32>
    %cst_21 = arith.constant 1.000000e+00 : f32
    %75 = vector.broadcast %cst_21 : f32 to vector<8x32xf32>
    %76 = arith.addf %75, %74 : vector<8x32xf32>
    %77 = arith.divf %75, %76 : vector<8x32xf32>
    %78 = vector.extract_strided_slice %57 {offsets = [0, 64], sizes = [8, 32], strides = [1, 1]} : vector<8x96xf32> to vector<8x32xf32>
    %79 = vector.extract_strided_slice %61 {offsets = [0, 64], sizes = [8, 32], strides = [1, 1]} : vector<8x96xf32> to vector<8x32xf32>
    %80 = arith.mulf %69, %79 : vector<8x32xf32>
    %81 = arith.addf %78, %80 : vector<8x32xf32>
    %82 = math.tanh %81 : vector<8x32xf32>
    %cst_22 = arith.constant 1.000000e+00 : f32
    %83 = vector.broadcast %cst_22 : f32 to vector<8x32xf32>
    %84 = arith.subf %83, %77 : vector<8x32xf32>
    %85 = arith.mulf %84, %82 : vector<8x32xf32>
    %86 = arith.mulf %77, %46 : vector<8x32xf32>
    %87 = arith.addf %85, %86 : vector<8x32xf32>
    %88 = arith.addi %6, %c1_i32 : i32
    %89 = vector.broadcast %88 : i32 to vector<8x1xi32>
    %90 = arith.cmpi sgt, %3, %89 : vector<8x1xi32>
    %91 = vector.shape_cast %90 : vector<8x1xi1> to vector<8x1xi1>
    %92 = vector.broadcast %91 : vector<8x1xi1> to vector<8x32xi1>
    %93 = arith.select %92, %87, %46 : vector<8x32xi1>, vector<8x32xf32>
    %cst_23 = arith.constant 0.000000e+00 : f32
    %94 = vector.shape_cast %90 : vector<8x1xi1> to vector<8x1xi1>
    %95 = vector.broadcast %94 : vector<8x1xi1> to vector<8x32xi1>
    %96 = vector.broadcast %cst_23 : f32 to vector<8x32xf32>
    %97 = arith.select %95, %93, %96 : vector<8x32xi1>, vector<8x32xf32>
    %98 = arith.index_cast %c1_i32 : i32 to index
    %c0_24 = arith.constant 0 : index
    %c0_25 = arith.constant 0 : index
    %99 = vector.load %arg7[%98, %c0_24, %c0_25] : memref<4x8x32xf32, #tpu.memory_space<vmem>>, vector<1x8x32xf32>
    %100 = vector.shape_cast %99 : vector<1x8x32xf32> to vector<8x32xf32>
    %101 = vector.shape_cast %97 : vector<8x32xf32> to vector<1x8x32xf32>
    tpu.vector_store %arg7[%98, %c0_24, %c0_25], %101 {strides = array<i32>} : memref<4x8x32xf32, #tpu.memory_space<vmem>>, vector<1x8x32xf32>,
    %c2_i32 = arith.constant 2 : i32
    %102 = arith.index_cast %c2_i32 : i32 to index
    %c0_26 = arith.constant 0 : index
    %c0_27 = arith.constant 0 : index
    %103 = vector.load %arg2[%102, %c0_26, %c0_27] : memref<4x8x96xf32, #tpu.memory_space<vmem>>, vector<1x8x96xf32>
    %104 = vector.shape_cast %103 : vector<1x8x96xf32> to vector<8x96xf32>
    %105 = arith.truncf %93 : vector<8x32xf32> to vector<8x32xbf16>
    %cst_28 = arith.constant dense<0.000000e+00> : vector<8x96xf32>
    %106 = tpu.matmul %105, %5, %cst_28 {dimension_numbers = #tpu.dot_dimension_numbers<[1], [0], [0], [1], [0, 0, 1, 1], [], []>} : vector<8x32xbf16>, vector<32x96xbf16>, vector<8x96xf32> -> vector<8x96xf32>
    %107 = vector.broadcast %4 : vector<1x96xf32> to vector<8x96xf32>
    %108 = arith.addf %106, %107 : vector<8x96xf32>
    %109 = vector.extract_strided_slice %104 {offsets = [0, 0], sizes = [8, 32], strides = [1, 1]} : vector<8x96xf32> to vector<8x32xf32>
    %110 = vector.extract_strided_slice %108 {offsets = [0, 0], sizes = [8, 32], strides = [1, 1]} : vector<8x96xf32> to vector<8x32xf32>
    %111 = arith.addf %109, %110 : vector<8x32xf32>
    %112 = arith.negf %111 : vector<8x32xf32>
    %113 = math.exp %112 : vector<8x32xf32>
    %cst_29 = arith.constant 1.000000e+00 : f32
    %114 = vector.broadcast %cst_29 : f32 to vector<8x32xf32>
    %115 = arith.addf %114, %113 : vector<8x32xf32>
    %116 = arith.divf %114, %115 : vector<8x32xf32>
    %117 = vector.extract_strided_slice %104 {offsets = [0, 32], sizes = [8, 32], strides = [1, 1]} : vector<8x96xf32> to vector<8x32xf32>
    %118 = vector.extract_strided_slice %108 {offsets = [0, 32], sizes = [8, 32], strides = [1, 1]} : vector<8x96xf32> to vector<8x32xf32>
    %119 = arith.addf %117, %118 : vector<8x32xf32>
    %120 = arith.negf %119 : vector<8x32xf32>
    %121 = math.exp %120 : vector<8x32xf32>
    %cst_30 = arith.constant 1.000000e+00 : f32
    %122 = vector.broadcast %cst_30 : f32 to vector<8x32xf32>
    %123 = arith.addf %122, %121 : vector<8x32xf32>
    %124 = arith.divf %122, %123 : vector<8x32xf32>
    %125 = vector.extract_strided_slice %104 {offsets = [0, 64], sizes = [8, 32], strides = [1, 1]} : vector<8x96xf32> to vector<8x32xf32>
    %126 = vector.extract_strided_slice %108 {offsets = [0, 64], sizes = [8, 32], strides = [1, 1]} : vector<8x96xf32> to vector<8x32xf32>
    %127 = arith.mulf %116, %126 : vector<8x32xf32>
    %128 = arith.addf %125, %127 : vector<8x32xf32>
    %129 = math.tanh %128 : vector<8x32xf32>
    %cst_31 = arith.constant 1.000000e+00 : f32
    %130 = vector.broadcast %cst_31 : f32 to vector<8x32xf32>
    %131 = arith.subf %130, %124 : vector<8x32xf32>
    %132 = arith.mulf %131, %129 : vector<8x32xf32>
    %133 = arith.mulf %124, %93 : vector<8x32xf32>
    %134 = arith.addf %132, %133 : vector<8x32xf32>
    %135 = arith.addi %6, %c2_i32 : i32
    %136 = vector.broadcast %135 : i32 to vector<8x1xi32>
    %137 = arith.cmpi sgt, %3, %136 : vector<8x1xi32>
    %138 = vector.shape_cast %137 : vector<8x1xi1> to vector<8x1xi1>
    %139 = vector.broadcast %138 : vector<8x1xi1> to vector<8x32xi1>
    %140 = arith.select %139, %134, %93 : vector<8x32xi1>, vector<8x32xf32>
    %cst_32 = arith.constant 0.000000e+00 : f32
    %141 = vector.shape_cast %137 : vector<8x1xi1> to vector<8x1xi1>
    %142 = vector.broadcast %141 : vector<8x1xi1> to vector<8x32xi1>
    %143 = vector.broadcast %cst_32 : f32 to vector<8x32xf32>
    %144 = arith.select %142, %140, %143 : vector<8x32xi1>, vector<8x32xf32>
    %145 = arith.index_cast %c2_i32 : i32 to index
    %c0_33 = arith.constant 0 : index
    %c0_34 = arith.constant 0 : index
    %146 = vector.load %arg7[%145, %c0_33, %c0_34] : memref<4x8x32xf32, #tpu.memory_space<vmem>>, vector<1x8x32xf32>
    %147 = vector.shape_cast %146 : vector<1x8x32xf32> to vector<8x32xf32>
    %148 = vector.shape_cast %144 : vector<8x32xf32> to vector<1x8x32xf32>
    tpu.vector_store %arg7[%145, %c0_33, %c0_34], %148 {strides = array<i32>} : memref<4x8x32xf32, #tpu.memory_space<vmem>>, vector<1x8x32xf32>,
    %c3_i32 = arith.constant 3 : i32
    %149 = arith.index_cast %c3_i32 : i32 to index
    %c0_35 = arith.constant 0 : index
    %c0_36 = arith.constant 0 : index
    %150 = vector.load %arg2[%149, %c0_35, %c0_36] : memref<4x8x96xf32, #tpu.memory_space<vmem>>, vector<1x8x96xf32>
    %151 = vector.shape_cast %150 : vector<1x8x96xf32> to vector<8x96xf32>
    %152 = arith.truncf %140 : vector<8x32xf32> to vector<8x32xbf16>
    %cst_37 = arith.constant dense<0.000000e+00> : vector<8x96xf32>
    %153 = tpu.matmul %152, %5, %cst_37 {dimension_numbers = #tpu.dot_dimension_numbers<[1], [0], [0], [1], [0, 0, 1, 1], [], []>} : vector<8x32xbf16>, vector<32x96xbf16>, vector<8x96xf32> -> vector<8x96xf32>
    %154 = vector.broadcast %4 : vector<1x96xf32> to vector<8x96xf32>
    %155 = arith.addf %153, %154 : vector<8x96xf32>
    %156 = vector.extract_strided_slice %151 {offsets = [0, 0], sizes = [8, 32], strides = [1, 1]} : vector<8x96xf32> to vector<8x32xf32>
    %157 = vector.extract_strided_slice %155 {offsets = [0, 0], sizes = [8, 32], strides = [1, 1]} : vector<8x96xf32> to vector<8x32xf32>
    %158 = arith.addf %156, %157 : vector<8x32xf32>
    %159 = arith.negf %158 : vector<8x32xf32>
    %160 = math.exp %159 : vector<8x32xf32>
    %cst_38 = arith.constant 1.000000e+00 : f32
    %161 = vector.broadcast %cst_38 : f32 to vector<8x32xf32>
    %162 = arith.addf %161, %160 : vector<8x32xf32>
    %163 = arith.divf %161, %162 : vector<8x32xf32>
    %164 = vector.extract_strided_slice %151 {offsets = [0, 32], sizes = [8, 32], strides = [1, 1]} : vector<8x96xf32> to vector<8x32xf32>
    %165 = vector.extract_strided_slice %155 {offsets = [0, 32], sizes = [8, 32], strides = [1, 1]} : vector<8x96xf32> to vector<8x32xf32>
    %166 = arith.addf %164, %165 : vector<8x32xf32>
    %167 = arith.negf %166 : vector<8x32xf32>
    %168 = math.exp %167 : vector<8x32xf32>
    %cst_39 = arith.constant 1.000000e+00 : f32
    %169 = vector.broadcast %cst_39 : f32 to vector<8x32xf32>
    %170 = arith.addf %169, %168 : vector<8x32xf32>
    %171 = arith.divf %169, %170 : vector<8x32xf32>
    %172 = vector.extract_strided_slice %151 {offsets = [0, 64], sizes = [8, 32], strides = [1, 1]} : vector<8x96xf32> to vector<8x32xf32>
    %173 = vector.extract_strided_slice %155 {offsets = [0, 64], sizes = [8, 32], strides = [1, 1]} : vector<8x96xf32> to vector<8x32xf32>
    %174 = arith.mulf %163, %173 : vector<8x32xf32>
    %175 = arith.addf %172, %174 : vector<8x32xf32>
    %176 = math.tanh %175 : vector<8x32xf32>
    %cst_40 = arith.constant 1.000000e+00 : f32
    %177 = vector.broadcast %cst_40 : f32 to vector<8x32xf32>
    %178 = arith.subf %177, %171 : vector<8x32xf32>
    %179 = arith.mulf %178, %176 : vector<8x32xf32>
    %180 = arith.mulf %171, %140 : vector<8x32xf32>
    %181 = arith.addf %179, %180 : vector<8x32xf32>
    %182 = arith.addi %6, %c3_i32 : i32
    %183 = vector.broadcast %182 : i32 to vector<8x1xi32>
    %184 = arith.cmpi sgt, %3, %183 : vector<8x1xi32>
    %185 = vector.shape_cast %184 : vector<8x1xi1> to vector<8x1xi1>
    %186 = vector.broadcast %185 : vector<8x1xi1> to vector<8x32xi1>
    %187 = arith.select %186, %181, %140 : vector<8x32xi1>, vector<8x32xf32>
    %cst_41 = arith.constant 0.000000e+00 : f32
    %188 = vector.shape_cast %184 : vector<8x1xi1> to vector<8x1xi1>
    %189 = vector.broadcast %188 : vector<8x1xi1> to vector<8x32xi1>
    %190 = vector.broadcast %cst_41 : f32 to vector<8x32xf32>
    %191 = arith.select %189, %187, %190 : vector<8x32xi1>, vector<8x32xf32>
    %192 = arith.index_cast %c3_i32 : i32 to index
    %c0_42 = arith.constant 0 : index
    %c0_43 = arith.constant 0 : index
    %193 = vector.load %arg7[%192, %c0_42, %c0_43] : memref<4x8x32xf32, #tpu.memory_space<vmem>>, vector<1x8x32xf32>
    %194 = vector.shape_cast %193 : vector<1x8x32xf32> to vector<8x32xf32>
    %195 = vector.shape_cast %191 : vector<8x32xf32> to vector<1x8x32xf32>
    tpu.vector_store %arg7[%192, %c0_42, %c0_43], %195 {strides = array<i32>} : memref<4x8x32xf32, #tpu.memory_space<vmem>>, vector<1x8x32xf32>,
    %c4_i32_44 = arith.constant 4 : i32
    %c0_45 = arith.constant 0 : index
    %c0_46 = arith.constant 0 : index
    %196 = vector.load %arg8[%c0_45, %c0_46] : memref<8x32xf32, #tpu.memory_space<vmem>>, vector<8x32xf32>
    tpu.vector_store %arg8[%c0_45, %c0_46], %187 {strides = array<i32>} : memref<8x32xf32, #tpu.memory_space<vmem>>, vector<8x32xf32>,
    return
  }
  func.func @transform_0(%arg0: i32, %arg1: i32) -> (i32, i32, i32) {
    %c0_i32 = arith.constant 0 : i32
    %c0_i32_0 = arith.constant 0 : i32
    return %arg1, %arg0, %c0_i32 : i32, i32, i32
  }
  func.func @transform_1(%arg0: i32, %arg1: i32) -> (i32, i32) {
    %c0_i32 = arith.constant 0 : i32
    %c0_i32_0 = arith.constant 0 : i32
    return %arg0, %c0_i32 : i32, i32
  }
  func.func @transform_2(%arg0: i32, %arg1: i32) -> (i32, i32) {
    %c0_i32 = arith.constant 0 : i32
    %c0_i32_0 = arith.constant 0 : i32
    return %arg0, %c0_i32 : i32, i32
  }
  func.func @transform_3(%arg0: i32, %arg1: i32) -> (i32, i32) {
    %c0_i32 = arith.constant 0 : i32
    %c0_i32_0 = arith.constant 0 : i32
    %c0_i32_1 = arith.constant 0 : i32
    return %c0_i32, %c0_i32_0 : i32, i32
  }
  func.func @transform_4(%arg0: i32, %arg1: i32) -> (i32, i32) {
    %c0_i32 = arith.constant 0 : i32
    %c0_i32_0 = arith.constant 0 : i32
    %c0_i32_1 = arith.constant 0 : i32
    return %c0_i32, %c0_i32_0 : i32, i32
  }
  func.func @transform_5(%arg0: i32, %arg1: i32) -> (i32, i32, i32) {
    %c0_i32 = arith.constant 0 : i32
    %c0_i32_0 = arith.constant 0 : i32
    return %arg1, %arg0, %c0_i32 : i32, i32, i32
  }
  func.func @transform_6(%arg0: i32, %arg1: i32) -> (i32, i32) {
    %c0_i32 = arith.constant 0 : i32
    %c0_i32_0 = arith.constant 0 : i32
    return %arg0, %c0_i32 : i32, i32
  }
}

</mosaic_0001>

<bundles_post_ra>
// kernel: tpu_custom_call.1
= control target key start
LH: loop header
LB: loop body
LE: loop exit
PB: predicated region body
PF: predicated region fallthrough
CT: control target
= control target key end

     0   :  { %s1645_s0 = inlined_call_operand.hbm [shape: f32[8,8,96], index: 0, kind: input, shape index: {}]   ;;  %s1646_s1 = inlined_call_operand.vmem [shape: s32[8,1], index: 1, kind: input, shape index: {}]   ;;  %s1647_s2 = inlined_call_operand.vmem [shape: f32[8,32], index: 2, kind: input, shape index: {}]   ;;  %s1648_s3 = inlined_call_operand.hbm [shape: bf16[32,96], index: 3, kind: input, shape index: {}]   ;;  %s1649_s4 = inlined_call_operand.vmem [shape: f32[1,96], index: 4, kind: input, shape index: {}]   ;;  %s1650_s5 = inlined_call_operand.hbm [shape: f32[8,8,32], index: 5, kind: output, shape index: {0}]   ;;  %s1651_s6 = inlined_call_operand.hbm [shape: f32[8,32], index: 6, kind: output, shape index: {1}]  }
   0x1   :  { %1658 = sst [smem:[#allocation17_spill]] %s1648_s3 }
   0x2   :  { %12 = vsyncpa [#allocation3], 0 }
   0x3   :  { %14 = vsyncpa [#allocation3 + $0x1], 0 }
   0x4   :  { %15 = vsyncpa [#allocation6], 0 }
   0x5   :  { %16 = vsyncpa [#allocation4], 0 }
   0x6   :  { %18 = vsyncpa [#allocation4 + $0x1], 0 }
   0x7   :  { %19 = vsyncpa [#allocation9], 0  ;;  %s1335_s21 = smov 0   ;;  %s1337_s22 = smov 0  }
   0x8   :  { %s1339_s23 = smov 0   ;;  %s1341_s24 = smov 0  }
   0x9   :  { %s1343_s25 = smov 0   ;;  %s1345_s26 = smov 0  }
   0xa LB: > { %1659 = sst [smem:[#allocation14_spill]] %s1278_s25  ;;  %s910_s27 = sadd.s32 4294967295, %s1282_s26   ;;  %s1282_s26 = sphi %s1345_s26, %s25_s26   ;;  %s1278_s25 = sphi %s1343_s25, %s1678_s25   ;;  %s1274_s24 = sphi %s1341_s24, %s1677_s24   ;;  %s1270_s23 = sphi %s1339_s23, %s1681_s23   ;;  %s1266_s22 = sphi %s1337_s22, %s1680_s22   ;;  %s1262_s21 = sphi %s1335_s21, %s1679_s21  }
   0xb   : > { %s911_s28 = sadd.s32 4294967294, %s1282_s26   ;;  %p59_p0 = scmp.ne.s32.totalorder %s1266_s22, %s1262_s21 }
   0xc   : > { %p1369_p1 = scmp.eq.s32.totalorder %s910_s27, 0  ;;  %p1373_p2 = scmp.eq.s32.totalorder %s910_s27, 1 }
   0xd   : > { %p185_p3 = scmp.eq.s32.totalorder %s911_s28, 1  ;;  %p912_p5 = scmp.ge.s32.totalorder %s1282_s26, 1 }
   0xe   : > { %s1661_s30 = scalar_select %p1373_p2, 1, 0 }
   0xf   : > { %p1379_p4 = por %p1369_p1, %p59_p0  ;;  %p1384_p6 = por %p185_p3, %p59_p0 }
  0x10   : > { %p218_p7 = scmp.lt.s32.totalorder %s1282_s26, 3  ;;  %s1284_s10 = smov [#allocation5]  }
  0x11   : > { %s1662_s7 = scalar_select %p1379_p4, 1, 0 }
  0x12   : > { %s1663_s8 = scalar_select %p1384_p6, 1, 0 }
  0x13   : > { %p1389_p8 = pnand %p912_p5, %p218_p7  ;;  %s244_s11 = sshll.u32 %s1284_s10, 4  ;;  %s245_s11 = int_to_ptr.vmem [resolvable:$true] %s244_s11 }
  0x14   : > { %1664 = sst [smem:[#allocation15_spill]] %s1663_s8  ;;  %s34_s13 = sadd.s32 1, %s1278_s25 }
  0x15   : > { %p1008_p9 = pneg %p1389_p8  ;;  %s1127_s14 = scalar_lea.vmem %s245_s11, 256 }
  0x16   : > { %p1128_p13 = scmp.ne.s32.totalorder %s245_s11, %s1127_s14  ;;  %p1135_p5 = scmp.lt.s32.totalorder %s245_s11, %s245_s11 }
  0x17   : > { %p1398_p11 = pnand %p1008_p9, %p1369_p1  ;;  %p1136_p7 = scmp.lt.s32.totalorder %s1127_s14, %s1127_s14 }
  0x19   : > { %p1118_p12 = pneg %p1398_p11  ;;  %p1137_p6 = por %p1136_p7, %p1135_p5 }
  0x1b   : > { %p1130_p0 = pnand %p1128_p13, %p1118_p12 }
  0x1d   : > { %p1131_p3 = pneg %p1130_p0 }
  0x1f   : > { %p1138_p4 = pnand %p1137_p6, %p1131_p3 }
  0x21   : > { %1141 = shalt.err (!%p1138_p4)
}
  0x22   : > { %s1285_s15 = smov 64   ;;  %s1286_s16 = smov 4  }
  0x23   : > { %s1667_s3 = sld [smem:[#allocation17_spill]]  ;;  %p35_p6 = scmp.ge.s32.totalorder %s34_s13, 2 }
  0x24   : > { %s46_s19 = sadd.s32 1, %s1270_s23  ;;  %p53_p4 = scmp.ne.s32.totalorder %s1270_s23, %s1266_s22 }
  0x25   : > { %p54_p9 = scmp.eq.s32.totalorder %s1282_s26, 0  ;;  %s1683_s13 = smov (%p35_p6, %s34_s13), 0 }
  0x26   : > { %1668 = sst [smem:[#allocation16_spill]] %s1683_s13  ;;  %p1422_p13 = por %p1373_p2, %p53_p4 }
  0x27   : > { %p1416_p12 = por %p54_p9, %p53_p4  ;;  %s41_s28 = ssub.s32 %s1278_s25, %s1683_s13 }
  0x28   : > { %p1021_p0 = scmp.lt.s32.totalorder %s1282_s26, 2  ;;  %s261_s10 = sand.u32 1, %s1270_s23  }
  0x29   : > { %1011 = dma.hbm_to_vmem [thread:$0]  (!%p1398_p11), %s1667_s3, 256, %s245_s11, [#allocation6], %s1285_s15, %s1285_s15, %s1286_s16  }
  0x2a   : > { %p44_p11 = scmp.eq.s32.totalorder %s41_s28, 0  ;;  %s917_s11 = sshll.u32 %s261_s10, 5 }
  0x2b   : > { %s950_s14 = sshll.u32 %s1278_s25, 9  ;;  %s265_s18 = scalar_lea.vmem [#allocation2], %s917_s11 }
  0x2c   : > { %s1431_s12 = scalar_select %p44_p11, %s1270_s23, %s46_s19  }
  0x2d   : > { %s272_s17 = scalar_lea.hbm %s1645_s0, %s950_s14  ;;  %s273_s3 = sshll.u32 %s265_s18, 4  ;;  %s274_s3 = int_to_ptr.vmem [resolvable:$true] %s273_s3 }
  0x2e   : > { %p1439_p3 = pnand %p1021_p0, %p1416_p12  ;;  %s262_s13 = scalar_lea.sflag [#allocation3], %s261_s10 }
  0x2f   : > { %s1155_s28 = scalar_lea.vmem %s274_s3, 512  ;;  %s1287_s19 = smov [#allocation2]  }
  0x30   : > { %p1144_p5 = pneg %p1439_p3  ;;  %p1156_p7 = scmp.ne.s32.totalorder %s274_s3, %s1155_s28 }
  0x31   : > { %s1160_s25 = sshll.u32 %s1287_s19, 4  ;;  %s1161_s25 = int_to_ptr.vmem [resolvable:$false] %s1160_s25 }
  0x32   : > { %p1158_p6 = pnand %p1156_p7, %p1144_p5  ;;  %s1162_s14 = scalar_lea.vmem %s1161_s25, 1024 }
  0x33   : > { %p1163_p9 = scmp.lt.s32.totalorder %s274_s3, %s1161_s25  ;;  %p1164_p11 = scmp.lt.s32.totalorder %s1162_s14, %s1155_s28 }
  0x34   : > { %p1159_p4 = pneg %p1158_p6 }
  0x35   : > { %p1165_p10 = por %p1164_p11, %p1163_p9 }
  0x37   : > { %p1166_p2 = pnand %p1165_p10, %p1159_p4 }
  0x39   : > { %1169 = shalt.err (!%p1166_p2)
}
  0x3a   : > { %s1288_s20 = smov 128   ;;  %s1289_s11 = smov 8  }
  0x3b   : > { %1015 = dma.hbm_to_vmem [thread:$0]  (!%p1439_p3), %s272_s17, 512, %s274_s3, %s262_s13, %s1288_s20, %s1288_s20, %s1289_s11  }
  0x3c   : > { %285 = sbr.rel (%p1389_p8) target bundleno = 2831 (0xb0f), region = 40  ;;  %s1450_s10 = sand.u32 (!%p1389_p8), 1, %s1266_s22  }
  0x3d   : > { %s921_s15 = sshll.u32 (!%p1389_p8), %s1450_s10, 5  ;;  %s288_s25 = scalar_lea.sflag (!%p1389_p8), [#allocation3], %s1450_s10 }
  0x3e   : > { %s1454_s16 = scalar_lea.vmem (!%p1389_p8), [#allocation2], %s921_s15  ;;  %p1672_p10 = scmp.ne.s32.totalorder (!%p1389_p8), %s1662_s7, 0 }
  0x41   : > { %1245 = dma.done.wait (%p1672_p10), %s288_s25, 512  }
  0x42   : > { %1247 = vsyncadd (%p1672_p10), %s288_s25, 4294966784 }
  0x43   : > { %1249 = dma.done.wait (%p1369_p1), [#allocation6], 256  }
  0x44   : > { %1251 = vsyncadd (%p1369_p1), [#allocation6], 4294967040  ;;  %s1464_s3 = scalar_lea.vmem [#allocation7], %s921_s15  ;;  %p924_p2 = scmp.ne.s32.totalorder %s1274_s24, 0 }
  0x46   : > { %346 = sbr.rel (%p924_p2) target bundleno = 77 (0x4d), region = 52 }
  0x4b   : > { %v347_v0 = vld [vmem:[%s1647_s2] sm:$0xff]  ;;  %vm348_vm0 = vcmask 261120  }
  0x4c   : > { %349 = vst.msk [vmem:[#allocation8] sm:$0xff] %vm348_vm0, %v347_v0 }
  0x4d PF: > { %v1470_v1 = vld [vmem:[#allocation5 + $0x8] sm:$0xff]   ;;  %v1290_v2 = vmov 0.0   ;;  %v1475_v3 = vld [vmem:[#allocation5] sm:$0xff]   ;;  %vm1291_vm1 = vmmov 0   ;;  %vm378_vm2 = vcmask 261120   ;;  %s1292_s13 = smov 64  }
  0x4e   : > { %964 = vmatprep.subr.bf16.mxu0 %v1290_v2  ;;  %972 = vmatprep.subr.bf16.mxu1 %v1290_v2  ;;  %v1497_v6 = vld [vmem:[%s1649_s4] ss:$0 sm:$0xff]  ;;  %s1503_s17 = sshll.u32 %s1274_s24, 2  ;;  %v1293_v19 = vmov 0   ;;  %s1294_s19 = smov 32   ;;  %v931_v43 = vld [vmem:[%s1454_s16 + $0x8] sm:$0xff] }
  0x4f   : > { %965 = vmatpush3.bf16.msra.mxu0 %v1470_v1  ;;  %968 = vmatprep.mubr.msk.bf16.mxu0 %vm1291_vm1, %v1290_v2  ;;  %v358_v12 = vld [vmem:[%s1454_s16] sm:$0xff]  ;;  %v452_v18 = vstv %s1503_s17  ;;  %s1295_s14 = smov 96   ;;  %s541_s20 = sadd.s32 1, %s1503_s17 }
  0x50   : > { %966 = vmatprep.subr.bf16.mxu0 %v1290_v2  ;;  %973 = vmatpush3.bf16.msra.mxu1 %v1470_v1  ;;  %v1508_v17 = vld [vmem:[%s1646_s1] sm:$0xff]  ;;  %v542_v48 = vstv %s541_s20  ;;  %s632_s11 = sadd.s32 2, %s1503_s17  ;;  %s723_s15 = sadd.s32 3, %s1503_s17 }
  0x51   : > { %974 = vmatprep.subr.bf16.mxu1 %v1290_v2  ;;  %976 = vmatprep.mubr.msk.bf16.mxu1 %vm1291_vm1, %v1290_v2  ;;  %vm453_vm3 = vcmp.gt.s32.totalorder %v1508_v17, %v452_v18  ;;  %vm543_vm5 = vcmp.gt.s32.totalorder %v1508_v17, %v542_v48  ;;  %s951_s25 = sshll.u32 %s1274_s24, 9  ;;  %s1296_s8 = smov [#allocation8]  }
  0x52   : > { %1088 = vset.pattern.permute.xlu1 %v1293_v19  ;;  %v454_v20 = vsel %vm453_vm3, 1, %v1293_v19  ;;  %1089 = vset.pattern.permute.xlu0 %v1293_v19  ;;  %v544_v49 = vsel %vm543_vm5, 1, %v1293_v19  ;;  %s775_s9 = sshll.u32 %s1296_s8, 4  ;;  %s745_s24 = scalar_lea.sflag [#allocation4], %s1450_s10  ;;  %s1578_s9 = int_to_ptr.vmem [resolvable:$true] %s775_s9 }
  0x53   : > { %v357_v4 = vld [vmem:[#allocation8] sm:$0xff]  ;;  %967 = vmatpush3.bf16.msra.mxu0 %v1475_v3  ;;  %456 = vperm.xlu1 %1088, %v454_v20   ;;  %s1297_s18 = smov [#allocation7]  }
  0x54   : > { %v359_v5 = vpack.c.bf16 %v357_v4, %v357_v4  ;;  %975 = vmatpush3.bf16.msra.mxu1 %v1475_v3  ;;  %980 = vmatprep.subr.bf16.mxu0 %v1290_v2  ;;  %s1174_s28 = sshll.u32 %s1297_s18, 4  ;;  %s1175_s28 = int_to_ptr.vmem [resolvable:$false] %s1174_s28 }
  0x55   : > { %988 = vmatprep.subr.bf16.mxu1 %v1290_v2 }
  0x56   : > { %969 = vmatmul.mubr.msk.bf16.vlgmr.msra.gmra.mxu0 %vm378_vm2, %v359_v5 }
  0x57   : > { %981 = vmatpush3.bf16.msra.mxu0 %v1470_v1  ;;  %984 = vmatprep.mubr.msk.bf16.mxu0 %vm1291_vm1, %v1290_v2 }
  0x58   : > { %982 = vmatprep.subr.bf16.mxu0 %v1290_v2 }
  0x5b   : > { %983 = vmatpush3.bf16.msra.mxu0 %v1475_v3 }
  0xce   : > { %v457_v27 = vpop.permute.xlu1 %456 }
  0xcf   : > { %vm458_vm4 = vcmp.eq.s32.totalorder %v457_v27, 1 }
 0x116   : > { %v416_v7 = vpop.f32.mrf.mxu0 }
 0x117   : > { %v417_v8 = vadd.f32 %v1497_v6, %v416_v7 }
 0x118   : > { %v970_v9 = vpop.f32.mrf.mxu0 }
 0x119   : > { %430 = vrot.lane.b32.xlu0 %v417_v8, %s1292_s13  ;;  %v422_v13 = vadd.f32 %v417_v8, %v358_v12 }
 0x11a   : > { %v419_v10 = vpop.f32.mrf.mxu0 }
 0x11b   : > { %v930_v14 = vmul.f32 -1.442695, %v422_v13  ;;  %v935_v10 = vld [vmem:[%s1454_s16 + $0x10] sm:$0xff] }
 0x11c   : > { %v971_v11 = vpop.f32.mrf.mxu0 }
 0x11d   : > { %1092 = vpow2.f32 %v930_v14 }
 0x12a   : > { %v1093_v15 = vpop.eup %1092 }
 0x12b   : > { %v426_v16 = vadd.f32 1.0, %v1093_v15 }
 0x12d   : > { %1094 = vrcp.f32 %v426_v16 }
 0x13a   : > { %v1095_v21 = vpop.eup %1094 }
 0x13b   : > { %v440_v29 = vsub.f32 1.0, %v1095_v21 }
 0x18b   : > { %v431_v22 = vpop.permute.xlu0 %430 }
 0x18c   : > { %v433_v23 = vmul.f32 %v1095_v21, %v431_v22 }
 0x18e   : > { %435 = vrot.lane.b32.xlu0 %v433_v23, %s1292_s13 }
 0x192   : > { %447 = vrot.lane.b32.xlu0 %v357_v4, %s1294_s19  ;;  %s1176_s19 = scalar_lea.vmem %s1175_s28, 1024 }
 0x200   : > { %v436_v24 = vpop.permute.xlu0 %435 }
 0x201   : > { %v438_v25 = vadd.f32 %v436_v24, %v358_v12 }
 0x203   : > { %1096 = vtanh.f32 %v438_v25 }
 0x204   : > { %v448_v28 = vpop.permute.xlu0 %447 }
 0x205   : > { %v450_v31 = vmul.f32 %v1095_v21, %v448_v28 }
 0x210   : > { %v1097_v26 = vpop.eup %1096 }
 0x211   : > { %442 = vrot.lane.b32.xlu1 %v1097_v26, %s1295_s14 }
 0x283   : > { %v443_v30 = vpop.permute.xlu1 %442 }
 0x284   : > { %v445_v32 = vmul.f32 %v443_v30, %v440_v29 }
 0x286   : > { %v451_v33 = vadd.f32 %v450_v31, %v445_v32 }
 0x288   : > { %v459_v34 = vsel %vm458_vm4, %v451_v33, %v448_v28  ;;  %v1517_v35 = vsel %vm458_vm4, %v451_v33, 0.0  ;;  %v724_v33 = vstv %s723_s15 }
 0x289   : > { %v468_v36 = vpack.c.bf16 %v459_v34, %v459_v34  ;;  %vm725_vm9 = vcmp.gt.s32.totalorder %v1508_v17, %v724_v33 }
 0x28b   : > { %470 = vrot.lane.b32.xlu1 %v468_v36, %s1295_s14 }
 0x2fd   : > { %v471_v37 = vpop.permute.xlu1 %470 }
 0x2fe   : > { %977 = vmatmul.mubr.msk.bf16.vlgmr.msra.gmra.mxu1 %vm378_vm2, %v471_v37 }
 0x2ff   : > { %989 = vmatpush3.bf16.msra.mxu1 %v1470_v1  ;;  %992 = vmatprep.mubr.msk.bf16.mxu1 %vm1291_vm1, %v1290_v2 }
 0x300   : > { %990 = vmatprep.subr.bf16.mxu1 %v1290_v2  ;;  %v633_v2 = vstv %s632_s11 }
 0x301   : > { %vm634_vm7 = vcmp.gt.s32.totalorder %v1508_v17, %v633_v2 }
 0x302   : > { %v635_v8 = vsel %vm634_vm7, 1, %v1293_v19 }
 0x303   : > { %991 = vmatpush3.bf16.msra.mxu1 %v1475_v3 }
 0x3be   : > { %v509_v38 = vpop.f32.mrf.mxu1 }
 0x3bf   : > { %v510_v39 = vadd.f32 %v1497_v6, %v509_v38 }
 0x3c0   : > { %v978_v40 = vpop.f32.mrf.mxu1 }
 0x3c1   : > { %523 = vrot.lane.b32.xlu0 %v510_v39, %s1292_s13  ;;  %v515_v44 = vadd.f32 %v931_v43, %v510_v39  ;;  %v726_v39 = vsel %vm725_vm9, 1, %v1293_v19 }
 0x3c2   : > { %v512_v41 = vpop.f32.mrf.mxu1 }
 0x3c3   : > { %v933_v45 = vmul.f32 -1.442695, %v515_v44  ;;  %v939_v41 = vld [vmem:[%s1454_s16 + $0x18] sm:$0xff]  ;;  %s759_s16 = sshll.u32 %s1464_s3, 4  ;;  %s1576_s16 = int_to_ptr.vmem [resolvable:$true] %s759_s16 }
 0x3c4   : > { %v979_v42 = vpop.f32.mrf.mxu1  ;;  %s1170_s17 = scalar_lea.vmem %s1576_s16, 512  ;;  %p1177_p0 = scmp.lt.s32.totalorder %s1576_s16, %s1175_s28 }
 0x3c5   : > { %1098 = vpow2.f32 %v933_v45  ;;  %546 = vperm.xlu0 %1089, %v544_v49   ;;  %p1171_p1 = scmp.ne.s32.totalorder %s1576_s16, %s1170_s17  ;;  %p1178_p3 = scmp.lt.s32.totalorder %s1176_s19, %s1170_s17 }
 0x3c7   : > { %p1172_p8 = pnand %p1171_p1, %p1422_p13  ;;  %p1179_p5 = por %p1178_p3, %p1177_p0 }
 0x3c9   : > { %p1173_p12 = pneg %p1172_p8 }
 0x3cb   : > { %p1180_p7 = pnand %p1179_p5, %p1173_p12 }
 0x3d2   : > { %v1099_v46 = vpop.eup %1098 }
 0x3d3   : > { %v519_v47 = vadd.f32 1.0, %v1099_v46 }
 0x3d5   : > { %1100 = vrcp.f32 %v519_v47 }
 0x3e2   : > { %v1101_v50 = vpop.eup %1100 }
 0x3e3   : > { %v533_v56 = vsub.f32 1.0, %v1101_v50  ;;  %v539_v59 = vmul.f32 %v1101_v50, %v459_v34 }
 0x433   : > { %v524_v51 = vpop.permute.xlu0 %523 }
 0x434   : > { %v526_v52 = vmul.f32 %v1101_v50, %v524_v51 }
 0x436   : > { %528 = vrot.lane.b32.xlu1 %v526_v52, %s1292_s13 }
 0x440   : > { %v547_v57 = vpop.permute.xlu0 %546 }
 0x441   : > { %vm548_vm6 = vcmp.eq.s32.totalorder %v547_v57, 1 }
 0x4a8   : > { %v529_v53 = vpop.permute.xlu1 %528 }
 0x4a9   : > { %v531_v54 = vadd.f32 %v931_v43, %v529_v53 }
 0x4ab   : > { %1102 = vtanh.f32 %v531_v54 }
 0x4b8   : > { %v1103_v55 = vpop.eup %1102 }
 0x4b9   : > { %535 = vrot.lane.b32.xlu1 %v1103_v55, %s1295_s14 }
 0x52b   : > { %v536_v58 = vpop.permute.xlu1 %535 }
 0x52c   : > { %v538_v60 = vmul.f32 %v536_v58, %v533_v56 }
 0x52e   : > { %v540_v61 = vadd.f32 %v539_v59, %v538_v60 }
 0x530   : > { %v549_v62 = vsel %vm548_vm6, %v540_v61, %v459_v34  ;;  %v1534_v63 = vsel %vm548_vm6, %v540_v61, 0.0 }
 0x531   : > { %v559_v0 = vpack.c.bf16 %v549_v62, %v549_v62 }
 0x533   : > { %561 = vrot.lane.b32.xlu1 %v559_v0, %s1295_s14 }
 0x5a5   : > { %v562_v1 = vpop.permute.xlu1 %561 }
 0x5a6   : > { %985 = vmatmul.mubr.msk.bf16.vlgmr.msra.gmra.mxu0 %vm378_vm2, %v562_v1 }
 0x666   : > { %v600_v3 = vpop.f32.mrf.mxu0 }
 0x667   : > { %v601_v4 = vadd.f32 %v1497_v6, %v600_v3 }
 0x668   : > { %v986_v5 = vpop.f32.mrf.mxu0 }
 0x669   : > { %614 = vrot.lane.b32.xlu0 %v601_v4, %s1292_s13  ;;  %v606_v11 = vadd.f32 %v935_v10, %v601_v4 }
 0x66a   : > { %v603_v7 = vpop.f32.mrf.mxu0 }
 0x66b   : > { %v937_v12 = vmul.f32 -1.442695, %v606_v11 }
 0x66c   : > { %v987_v9 = vpop.f32.mrf.mxu0 }
 0x66d   : > { %637 = vperm.xlu0 %1089, %v635_v8   ;;  %1104 = vpow2.f32 %v937_v12 }
 0x67a   : > { %v1105_v13 = vpop.eup %1104 }
 0x67b   : > { %v610_v14 = vadd.f32 1.0, %v1105_v13 }
 0x67d   : > { %1106 = vrcp.f32 %v610_v14 }
 0x68a   : > { %v1107_v15 = vpop.eup %1106 }
 0x68b   : > { %v624_v23 = vsub.f32 1.0, %v1107_v15  ;;  %v630_v26 = vmul.f32 %v1107_v15, %v549_v62 }
 0x6db   : > { %v615_v16 = vpop.permute.xlu0 %614 }
 0x6dc   : > { %v617_v18 = vmul.f32 %v1107_v15, %v615_v16 }
 0x6de   : > { %619 = vrot.lane.b32.xlu1 %v617_v18, %s1292_s13 }
 0x6e8   : > { %v638_v25 = vpop.permute.xlu0 %637 }
 0x6e9   : > { %vm639_vm8 = vcmp.eq.s32.totalorder %v638_v25, 1 }
 0x750   : > { %v620_v20 = vpop.permute.xlu1 %619 }
 0x751   : > { %v622_v21 = vadd.f32 %v935_v10, %v620_v20 }
 0x753   : > { %1108 = vtanh.f32 %v622_v21 }
 0x760   : > { %v1109_v22 = vpop.eup %1108 }
 0x761   : > { %626 = vrot.lane.b32.xlu1 %v1109_v22, %s1295_s14 }
 0x7d3   : > { %v627_v24 = vpop.permute.xlu1 %626 }
 0x7d4   : > { %v629_v27 = vmul.f32 %v627_v24, %v624_v23 }
 0x7d6   : > { %v631_v28 = vadd.f32 %v630_v26, %v629_v27 }
 0x7d8   : > { %v640_v29 = vsel %vm639_vm8, %v631_v28, %v549_v62  ;;  %v641_v30 = vsel %vm639_vm8, %v631_v28, 0.0 }
 0x7d9   : > { %v650_v31 = vpack.c.bf16 %v640_v29, %v640_v29 }
 0x7db   : > { %652 = vrot.lane.b32.xlu0 %v650_v31, %s1295_s14 }
 0x84d   : > { %v653_v32 = vpop.permute.xlu0 %652 }
 0x84e   : > { %993 = vmatmul.mubr.msk.bf16.vlgmr.msra.gmra.mxu1 %vm378_vm2, %v653_v32 }
 0x90e   : > { %v691_v34 = vpop.f32.mrf.mxu1 }
 0x90f   : > { %v692_v36 = vadd.f32 %v1497_v6, %v691_v34 }
 0x910   : > { %v994_v37 = vpop.f32.mrf.mxu1 }
 0x911   : > { %705 = vrot.lane.b32.xlu1 %v692_v36, %s1292_s13  ;;  %v697_v42 = vadd.f32 %v939_v41, %v692_v36 }
 0x912   : > { %v694_v38 = vpop.f32.mrf.mxu1 }
 0x913   : > { %v941_v6 = vmul.f32 -1.442695, %v697_v42 }
 0x914   : > { %v995_v40 = vpop.f32.mrf.mxu1 }
 0x915   : > { %728 = vperm.xlu1 %1088, %v726_v39   ;;  %1110 = vpow2.f32 %v941_v6 }
 0x919   : > { %462 = vrot.lane.b32.xlu1 %v1517_v35, %s1295_s14 }
 0x91d   : > { %643 = vrot.lane.b32.xlu1 %v641_v30, %s1295_s14 }
 0x922   : > { %v1111_v17 = vpop.eup %1110 }
 0x923   : > { %v701_v43 = vadd.f32 1.0, %v1111_v17 }
 0x925   : > { %1112 = vrcp.f32 %v701_v43 }
 0x932   : > { %v1113_v44 = vpop.eup %1112 }
 0x933   : > { %v715_v51 = vsub.f32 1.0, %v1113_v44  ;;  %v721_v53 = vmul.f32 %v1113_v44, %v640_v29 }
 0x983   : > { %v706_v45 = vpop.permute.xlu1 %705 }
 0x984   : > { %v708_v46 = vmul.f32 %v1113_v44, %v706_v45 }
 0x986   : > { %710 = vrot.lane.b32.xlu0 %v708_v46, %s1292_s13  ;;  %s1574_s13 = scalar_lea.hbm %s1650_s5, %s951_s25 }
 0x990   : > { %v729_v19 = vpop.permute.xlu1 %728 }
 0x991   : > { %vm730_vm10 = vcmp.eq.s32.totalorder %v729_v19, 1 }
 0x994   : > { %v463_v47 = vpop.permute.xlu1 %462 }
 0x995   : > { %465 = vst.msk [vmem:[%s1464_s3] sm:$0xff] %vm378_vm2, %v463_v47 }
 0x998   : > { %v644_v35 = vpop.permute.xlu1 %643 }
 0x999   : > { %938 = vst.msk [vmem:[%s1464_s3 + $0x10] sm:$0xff] %vm378_vm2, %v644_v35 }
 0x9f8   : > { %v711_v48 = vpop.permute.xlu0 %710 }
 0x9f9   : > { %v713_v49 = vadd.f32 %v939_v41, %v711_v48 }
 0x9fb   : > { %1114 = vtanh.f32 %v713_v49 }
 0xa08   : > { %v1115_v50 = vpop.eup %1114 }
 0xa09   : > { %717 = vrot.lane.b32.xlu0 %v1115_v50, %s1295_s14 }
 0xa0d   : > { %552 = vrot.lane.b32.xlu0 %v1534_v63, %s1295_s14 }
 0xa7b   : > { %v718_v52 = vpop.permute.xlu0 %717 }
 0xa7c   : > { %v720_v54 = vmul.f32 %v718_v52, %v715_v51 }
 0xa7e   : > { %v722_v55 = vadd.f32 %v721_v53, %v720_v54 }
 0xa7f   : > { %v553_v56 = vpop.permute.xlu0 %552 }
 0xa80   : > { %934 = vst.msk [vmem:[%s1464_s3 + $0x8] sm:$0xff] %vm378_vm2, %v553_v56  ;;  %v732_v57 = vsel %vm730_vm10, %v722_v55, 0.0  ;;  %v731_v58 = vsel %vm730_vm10, %v722_v55, %v640_v29 }
 0xa81   : > { %734 = vrot.lane.b32.xlu0 %v732_v57, %s1295_s14  ;;  %740 = vrot.lane.b32.xlu1 %v731_v58, %s1295_s14 }
 0xaf3   : > { %v741_v59 = vpop.permute.xlu1 %740  ;;  %v735_v60 = vpop.permute.xlu0 %734 }
 0xaf4   : > { %743 = vst.msk [vmem:[#allocation8] sm:$0xff] %vm378_vm2, %v741_v59  ;;  %942 = vst.msk [vmem:[%s1464_s3 + $0x18] sm:$0xff] %vm378_vm2, %v735_v60 }
 0xaf5   : > { %1183 = shalt.err (!%p1180_p7)
}
 0xaf6   : > { %s1184_s3 = scalar_lea.hbm %s1574_s13, 512  ;;  %s1188_s11 = scalar_lea.hbm %s1650_s5, 1024 }
 0xaf7   : > { %p1185_p6 = scmp.ne.s32.totalorder %s1574_s13, %s1184_s3  ;;  %p1189_p11 = scmp.lt.s32.totalorder %s1574_s13, %s1650_s5 }
 0xaf8   : > { %p1190_p10 = scmp.lt.s32.totalorder %s1188_s11, %s1184_s3 }
 0xaf9   : > { %p1186_p4 = pnand %p1185_p6, %p1422_p13 }
 0xafa   : > { %p1191_p2 = por %p1190_p10, %p1189_p11 }
 0xafb   : > { %p1187_p9 = pneg %p1186_p4 }
 0xafd   : > { %p1192_p1 = pnand %p1191_p2, %p1187_p9 }
 0xaff   : > { %1195 = shalt.err (!%p1192_p1)
}
 0xb00   : > { %s1298_s8 = smov 128   ;;  %s1299_s29 = smov 8  }
 0xb01   : > { %1002 = dma.vmem_to_hbm [thread:$0]  (%p1422_p13), %s1576_s16, 512, %s1574_s13, %s745_s24, %s1298_s8, %s1298_s8, %s1299_s29  }
 0xb02   : > { %s1196_s7 = scalar_lea.vmem %s1578_s9, 128  ;;  %p1673_p12 = scmp.ne.s32.totalorder %s1661_s30, 0 }
 0xb03   : > { %p1197_p8 = scmp.ne.s32.totalorder %s1578_s9, %s1196_s7  ;;  %p1203_p5 = scmp.lt.s32.totalorder %s1578_s9, %s1578_s9 }
 0xb04   : > { %p1204_p7 = scmp.lt.s32.totalorder %s1196_s7, %s1196_s7 }
 0xb05   : > { %p1198_p0 = pnand %p1197_p8, %p1673_p12 }
 0xb06   : > { %p1205_p6 = por %p1204_p7, %p1203_p5 }
 0xb07   : > { %p1199_p3 = pneg %p1198_p0 }
 0xb09   : > { %p1206_p4 = pnand %p1205_p6, %p1199_p3 }
 0xb0b   : > { %1209 = shalt.err (!%p1206_p4)
}
 0xb0c   : > { %1004 = dma.vmem_to_hbm [thread:$0]  (%p1673_p12), %s1578_s9, 128, %s1651_s6, [#allocation9]  }
 0xb0d   : > { %1253 = dma.done.wait (%p1673_p12), [#allocation9], 128  }
 0xb0e   : > { %1255 = vsyncadd (%p1673_p12), [#allocation9], 4294967168 }
 0xb0f PF: > { %s1674_s27 = sld [smem:[#allocation15_spill]]  ;;  %s791_s10 = sand.u32 1, %s1262_s21  }
 0xb10   : > { %p1676_p9 = scmp.ge.s32.totalorder %s1282_s26, 2  ;;  %s792_s16 = scalar_lea.sflag [#allocation4], %s791_s10 }
 0xb15   : > { %p1675_p13 = scmp.ne.s32.totalorder %s1674_s27, 0 }
 0xb17   : > { %p1017_p11 = pnand %p1676_p9, %p1675_p13 }
 0xb19   : > { %p1018_p10 = pneg %p1017_p11 }
 0xb1b   : > { %1257 = dma.done.wait (%p1018_p10), %s792_s16, 512  }
 0xb1c   : > { %1259 = vsyncadd (%p1018_p10), %s792_s16, 4294966784  ;;  %s25_s26 = sadd.s32 1, %s1282_s26   ;;  %s1677_s24 = sld [smem:[#allocation14_spill]] }
 0xb1d   : > { %p22_p2 = scmp.ge.s32.totalorder %s25_s26, 4   ;;  %s1678_s25 = sld [smem:[#allocation16_spill]] }
 0xb1e   : > { %s1679_s21 = smov %s1266_s22  ;;  %s1680_s22 = smov %s1270_s23 }
 0xb1f   : > { %s1681_s23 = smov %s1431_s12  ;;  %24 = sbr.rel (!%p22_p2) target bundleno = 10 (0xa), region = 114 }
 0xb24   :  { %797 = vsyncpa [#allocation3], 1 }
 0xb25   :  { %799 = vsyncpa [#allocation3 + $0x1], 1 }
 0xb26   :  { %800 = vsyncpa [#allocation6], 1 }
 0xb27   :  { %801 = vsyncpa [#allocation4], 1 }
 0xb28   :  { %803 = vsyncpa [#allocation4 + $0x1], 1 }
 0xb29   :  { %804 = vsyncpa [#allocation9], 1 }

</bundles_post_ra>
